<compile_context>
chip_gen: v7x
topology: tpu7x:2x2x1
jax: 0.10.0
libtpu: 0.0.40
codegen_flags: <defaults>
</compile_context>

<pallas_src>
import functools

import jax
import jax.numpy as jnp
from jax.experimental import pallas as pl
from jax.experimental.pallas import tpu as pltpu

_VMEM_LIMIT = None         # scoped-VMEM limit handed to Mosaic (per generation)
_VMEM_BLOCK_BUDGET = None  # budget for pipeline blocks + in-kernel scratch
_MODE_CACHE = {}           # per-config: "fused_sb" | "fused" | "matmul"


def _vmem_params():
    """Per-generation VMEM budget (v5e/v6e: 128 MiB physical, v7x: 64 MiB)."""
    global _VMEM_LIMIT, _VMEM_BLOCK_BUDGET
    if _VMEM_LIMIT is None:
        try:
            cap = pltpu.get_tpu_info().vmem_capacity_bytes
        except Exception:
            cap = 64 * 1024 * 1024                     # assume the smallest (v7x)
        # ~16 MiB headroom for Mosaic internals; allow big tiles on 128 MiB parts.
        _VMEM_LIMIT = min(max(cap - 16 * 1024 * 1024, 32 * 1024 * 1024),
                          110 * 1024 * 1024)
        _VMEM_BLOCK_BUDGET = int(_VMEM_LIMIT * 0.75)
    return _VMEM_LIMIT, _VMEM_BLOCK_BUDGET


def _pick_hb(h, w, row_bytes, fixed_bytes, budget, sublane, n_par):
    """Pick the H sub-tile for the fused kernel.

    Legal: hb divides H, and either hb == H (blocks equal the full dims) or
    hb % sublane == 0 (8 for f32 inputs, 16 for bf16) AND hb*W % 32 == 0 (so the
    merged 4*hb*W output lane axis is a multiple of 128).
    Preference order: fits the VMEM budget, >= 2 total grid steps (v7x megacore),
    hb*W a multiple of 256 (full v6e/v7x MXU columns), then the largest tile.
    The MXU-alignment preference never shrinks the tile by more than 2x.
    """
    legal = []
    for hb in range(h, 0, -1):
        if h % hb:
            continue
        if hb != h and (hb % sublane or (hb * w) % 32):
            continue
        legal.append(hb)                               # descending
    fit = [hb for hb in legal if hb * row_bytes + fixed_bytes <= budget]
    if not fit:
        fit = [legal[-1]]                              # smallest legal; may still OOM -> fallback
    best = fit[0]
    cands = [hb for hb in fit if 2 * hb >= best]       # don't over-shrink for alignment

    def score(hb):
        return (n_par * (h // hb) >= 2,                # keep both v7x TensorCores busy
                (hb * w) % 256 == 0,                   # full-width MXU columns
                hb)                                    # then: biggest tile

    return max(cands, key=score)


def _pick_tile_m(m, row_bytes, budget):
    """Row tile for the fallback matmul: as large as the VMEM budget allows,
    a divisor of M when possible (no padding / ragged tail), and leaving at
    least 2 grid steps so both v7x TensorCores get work."""
    t = min(1024, m)
    while t > 8 and 2 * t * row_bytes > budget:
        t //= 2
    if m % t:
        d = t - (t % 8)
        while d >= 8 and m % d:
            d -= 8
        if d >= 8:
            t = d
    if t == m and t % 16 == 0:
        t //= 2                                        # keep >= 2 grid steps (megacore)
    return max(t, 1)


# --------------------------------------------------------------------------- #
# Primary: fully fused kernel (transposed conv + tap scatter + channel concat) #
# --------------------------------------------------------------------------- #
def _upconv_fused_kernel(x_ref, skip_ref, w_ref, b_ref, o_ref):
    # x_ref    : (1, C_in,   1, hb, W)              input voxels for (n, d, h-tile)
    # skip_ref : (1, C_skip, 1, 2, 4*hb*W)          skip slab, lane-dense merged (2hb,2W)
    # w_ref    : (8*C_out, C_in)                    rows ordered (kd, kh, kw, co)
    # b_ref    : (8*C_out, 1)                       f32 bias, tiled over the 8 taps
    # o_ref    : (1, C_skip+C_out, 1, 2, 4*hb*W)    final concatenated output slab
    c_in, hb, w = x_ref.shape[1], x_ref.shape[3], x_ref.shape[4]
    c_skip = skip_ref.shape[1]
    c_out = w_ref.shape[0] // 8

    # torch.cat([skip, out], 1): pass the skip channels straight through
    # (cast in-kernel so the wrapper never makes an extra XLA cast pass).
    if c_skip:
        o_ref[0, :c_skip, 0] = skip_ref[0, :, 0].astype(o_ref.dtype)

    # Transposed conv: one MXU matmul covering all 8 kernel taps, f32 accumulate.
    x_mat = x_ref[0, :, 0].reshape(c_in, hb * w)                      # (C_in, hb*W)
    acc = jnp.dot(w_ref[...], x_mat, preferred_element_type=jnp.float32)
    acc = acc + b_ref[...]                                            # (8*C_out, hb*W)

    def tap(kd, kh, kw):
        r = (kd * 4 + kh * 2 + kw) * c_out
        return acc[r:r + c_out, :]                                    # (C_out, hb*W)

    # Scatter the 2x2x2 taps into the final layout.  The kd plane is written as a
    # single lane-dense (C_out, 4*hb*W) slab (merged (2hb, 2W) axis) -> unmasked vst.
    # TODO(synk): for bf16 outputs, pltpu.pack_elementwise could do the kw
    # interleave + cast in one VPU op and skip the lane shuffles below.
    for kd in range(2):
        rows = []
        for kh in range(2):
            # interleave the kw=0 / kw=1 taps along the (lane) W axis
            t = jnp.stack([tap(kd, kh, 0), tap(kd, kh, 1)], axis=-1)  # (C_out, hb*W, 2)
            rows.append(t.reshape(c_out * hb, 2 * w))                 # rows = (co, h)
        # interleave the kh=0 / kh=1 rows, then flatten to the merged lane axis
        plane = jnp.stack(rows, axis=1).reshape(c_out, 4 * hb * w)
        o_ref[0, c_skip:, 0, kd] = plane.astype(o_ref.dtype)


@functools.partial(jax.jit,
                   static_argnames=("compute_dtype", "out_dtype", "single_buffer_weights"))
def _up_conv_fused(skip, x, weight, bias, compute_dtype, out_dtype, single_buffer_weights):
    n, c_in, d, h, w = x.shape
    c_out = weight.shape[1]
    c_skip = skip.shape[1]
    c_total = c_skip + c_out
    cdt = jnp.dtype(compute_dtype)
    odt = jnp.dtype(out_dtype)
    vmem_limit, budget = _vmem_params()

    # (C_in, C_out, 2, 2, 2) -> (8*C_out, C_in), rows ordered (kd, kh, kw, co).
    w_all = jnp.transpose(weight, (2, 3, 4, 1, 0)).reshape(8 * c_out, c_in).astype(cdt)
    b_all = jnp.tile(bias.astype(jnp.float32), 8).reshape(8 * c_out, 1)
    x_in = x.astype(cdt)
    # Free (bitcast) reshape: split 2D -> (D, 2) and merge (2H, 2W) -> one lane-dense
    # axis so output / skip stores inside the kernel are >=128-lane wide.
    big = 4 * h * w
    skip_in = skip.reshape(n, c_skip, d, 2, big)

    isz = cdt.itemsize
    ssz = jnp.dtype(skip.dtype).itemsize
    osz = odt.itemsize
    # Bytes per unit of hb: double-buffered pipeline blocks + in-kernel f32 scratch
    # (accumulator + tap-interleave temporaries), per the v7x VMEM-accounting review.
    row_bytes = (2 * c_in * w * isz            # x blocks (2 buffers)
                 + 2 * 8 * c_skip * w * ssz    # skip blocks (2 buffers)
                 + 2 * 8 * c_total * w * osz   # output blocks (2 buffers)
                 + 8 * c_out * w * 4           # f32 accumulator
                 + 48 * c_out * w)             # f32 tap-shuffle temporaries
    wbufs = 1 if single_buffer_weights else 2
    fixed = wbufs * (w_all.size * isz + b_all.size * 4)
    sublane = 8 if isz >= 4 else 16            # bf16 sublane packing is 16
    hb = _pick_hb(h, w, row_bytes, fixed, budget, sublane, n * d)
    blk = 4 * hb * w
    # TODO(synk): add a W-axis grid dimension if a single (C_total * 8 * W) row slab
    # ever exceeds the VMEM budget (extremely wide + deep decoder stages).

    # Grid-invariant weight/bias: single buffer on request (saves VMEM on v7x).
    wmode = {"pipeline_mode": pl.Buffered(1)} if single_buffer_weights else {}

    grid = (n, d, h // hb)
    out = pl.pallas_call(
        _upconv_fused_kernel,
        out_shape=jax.ShapeDtypeStruct((n, c_total, d, 2, big), odt),
        grid_spec=pltpu.PrefetchScalarGridSpec(
            num_scalar_prefetch=0,
            grid=grid,
            in_specs=[
                pl.BlockSpec((1, c_in, 1, hb, w),
                             lambda ni, di, hi: (ni, 0, di, hi, 0)),
                pl.BlockSpec((1, c_skip, 1, 2, blk),
                             lambda ni, di, hi: (ni, 0, di, 0, hi)),
                pl.BlockSpec((8 * c_out, c_in), lambda ni, di, hi: (0, 0), **wmode),
                pl.BlockSpec((8 * c_out, 1), lambda ni, di, hi: (0, 0), **wmode),
            ],
            out_specs=pl.BlockSpec((1, c_total, 1, 2, blk),
                                   lambda ni, di, hi: (ni, 0, di, 0, hi)),
        ),
        compiler_params=pltpu.CompilerParams(
            dimension_semantics=("parallel", "parallel", "parallel"),
            vmem_limit_bytes=vmem_limit),
        cost_estimate=pl.CostEstimate(
            flops=2 * n * d * h * w * c_in * 8 * c_out,
            bytes_accessed=(x_in.size * isz + skip_in.size * ssz
                            + w_all.size * isz + n * c_total * d * 2 * big * osz),
            transcendentals=0),
    )(x_in, skip_in, w_all, b_all)

    # Free (bitcast) reshape back to NCDHW.
    return out.reshape(n, c_total, 2 * d, 2 * h, 2 * w)


# --------------------------------------------------------------------------- #
# Fallback: row-tiled matmul kernel + XLA scatter/concat glue (last resort)    #
# --------------------------------------------------------------------------- #
def _matmul_kernel(x_ref, w_ref, b_ref, o_ref):
    acc = jnp.dot(x_ref[...], w_ref[...], preferred_element_type=jnp.float32)
    o_ref[...] = (acc + b_ref[...]).astype(o_ref.dtype)


@functools.partial(jax.jit, static_argnames=("compute_dtype", "out_dtype"))
def _up_conv_matmul(skip, x, weight, bias, compute_dtype, out_dtype):
    n, c_in, d, h, w = x.shape
    c_out = weight.shape[1]
    cdt = jnp.dtype(compute_dtype)
    odt = jnp.dtype(out_dtype)
    vmem_limit, budget = _vmem_params()

    x_flat = jnp.transpose(x, (0, 2, 3, 4, 1)).reshape(-1, c_in).astype(cdt)
    m = x_flat.shape[0]
    n_out = c_out * 8
    w_flat = weight.reshape(c_in, n_out).astype(cdt)          # cols ordered (co, tap)
    b_cols = jnp.repeat(bias.astype(jnp.float32), 8).reshape(1, n_out)

    # Keep output columns lane-dense (multiple of 128) -> unmasked vector stores.
    n_out_p = ((n_out + 127) // 128) * 128
    if n_out_p != n_out:
        w_flat = jnp.pad(w_flat, ((0, 0), (0, n_out_p - n_out)))
        b_cols = jnp.pad(b_cols, ((0, 0), (0, n_out_p - n_out)))

    isz = cdt.itemsize
    osz = odt.itemsize
    # Account for the double-buffered weight/bias blocks (review item) and the
    # in-kernel f32 accumulator (+2*n_out_p because _pick_tile_m doubles row_bytes).
    fixed = 2 * (c_in * n_out_p * isz + n_out_p * 4)
    row_bytes = c_in * isz + n_out_p * osz + 2 * n_out_p
    tile_m = _pick_tile_m(m, row_bytes, max(budget - fixed, 4 << 20))
    m_pad = pl.cdiv(m, tile_m) * tile_m
    if m_pad != m:                    # rare: M has no multiple-of-8 divisor <= tile
        x_flat = jnp.pad(x_flat, ((0, m_pad - m), (0, 0)))

    out_flat = pl.pallas_call(
        _matmul_kernel,
        out_shape=jax.ShapeDtypeStruct((m_pad, n_out_p), odt),
        grid_spec=pltpu.PrefetchScalarGridSpec(
            num_scalar_prefetch=0,
            grid=(m_pad // tile_m,),
            in_specs=[
                pl.BlockSpec((tile_m, c_in), lambda i: (i, 0)),
                pl.BlockSpec((c_in, n_out_p), lambda i: (0, 0)),
                pl.BlockSpec((1, n_out_p), lambda i: (0, 0)),
            ],
            out_specs=pl.BlockSpec((tile_m, n_out_p), lambda i: (i, 0)),
        ),
        compiler_params=pltpu.CompilerParams(
            dimension_semantics=("parallel",),
            vmem_limit_bytes=vmem_limit),
        cost_estimate=pl.CostEstimate(
            flops=2 * m_pad * c_in * n_out_p,
            bytes_accessed=(m_pad * c_in * isz + c_in * n_out_p * isz
                            + m_pad * n_out_p * osz),
            transcendentals=0),
    )(x_flat, w_flat, b_cols)

    out = out_flat[:m, :n_out].reshape(n, d, h, w, c_out, 2, 2, 2)
    out = jnp.transpose(out, (0, 4, 1, 5, 2, 6, 3, 7))
    out = out.reshape(n, c_out, 2 * d, 2 * h, 2 * w).astype(odt)
    return jnp.concatenate([skip.astype(odt), out], axis=1)


# --------------------------------------------------------------------------- #
# Public wrapper                                                               #
# --------------------------------------------------------------------------- #
def _run_fused_sb(skip, x, weight, bias, cdt, odt):
    return _up_conv_fused(skip, x, weight, bias, compute_dtype=cdt, out_dtype=odt,
                          single_buffer_weights=True)


def _run_fused(skip, x, weight, bias, cdt, odt):
    return _up_conv_fused(skip, x, weight, bias, compute_dtype=cdt, out_dtype=odt,
                          single_buffer_weights=False)


def _run_matmul(skip, x, weight, bias, cdt, odt):
    return _up_conv_matmul(skip, x, weight, bias, compute_dtype=cdt, out_dtype=odt)


_DISPATCH = {"fused_sb": _run_fused_sb, "fused": _run_fused, "matmul": _run_matmul}
_MODE_ORDER = ("fused_sb", "fused", "matmul")


def up_conv(skip, x, weight, bias, *, compute_dtype=jnp.bfloat16, out_dtype=None):
    """UpConv forward: ConvTranspose3d(k=2, s=2, p=0)(x), then concat with `skip`.

    skip   : (N, C_skip, 2D, 2H, 2W)
    x      : (N, C_in,   D,  H,  W )
    weight : (C_in, C_out, 2, 2, 2)     (PyTorch ConvTranspose3d layout)
    bias   : (C_out,)
    returns: (N, C_skip + C_out, 2D, 2H, 2W)

    compute_dtype: MXU-input dtype (default bfloat16 — MXU-native on v5e/v6e/v7x,
                   halves input DMA; accumulation is always float32).  Pass
                   jnp.float32 for exact matmul inputs.
    out_dtype:     output dtype (default result_type(x, skip)); bfloat16 halves
                   the dominant 8x-expanded HBM writeback.
    """
    cdt = jnp.dtype(compute_dtype) if compute_dtype is not None else jnp.dtype(jnp.bfloat16)
    odt = (jnp.dtype(out_dtype) if out_dtype is not None
           else jnp.dtype(jnp.result_type(x.dtype, skip.dtype)))
    key = (skip.shape, x.shape, weight.shape,
           str(skip.dtype), str(x.dtype), str(cdt), str(odt))

    mode = _MODE_CACHE.get(key)
    if mode is not None:
        return _DISPATCH[mode](skip, x, weight, bias, cdt, odt)

    # Per-config probe: single-buffered-weights fused kernel -> default-buffered
    # fused kernel -> row-tiled matmul fallback.  If everything fails, re-raise.
    last_err = None
    for mode in _MODE_ORDER:
        try:
            out = _DISPATCH[mode](skip, x, weight, bias, cdt, odt)
            jax.block_until_ready(out)
            _MODE_CACHE[key] = mode
            return out
        except Exception as err:       # noqa: BLE001 — probing compile paths
            last_err = err
    raise last_err


def _reference_upconv(skip, x, weight, bias):
    """Independent pure-JAX reference (einsum over the disjoint 2x2x2 taps)."""
    n, c_in, d, h, w = x.shape
    c_out = weight.shape[1]
    out = jnp.einsum("nidhw,iokxy->nodkhxwy", x, weight)
    out = out.reshape(n, c_out, 2 * d, 2 * h, 2 * w) + bias.reshape(1, c_out, 1, 1, 1)
    return jnp.concatenate([skip, out], axis=1)


if __name__ == "__main__":
    key = jax.random.PRNGKey(0)
    k1, k2, k3, k4 = jax.random.split(key, 4)

    N, C_IN, C_OUT, C_SKIP = 2, 8, 8, 8
    D = H = W = 8

    x = jax.random.normal(k1, (N, C_IN, D, H, W), dtype=jnp.float32)
    skip = jax.random.normal(k2, (N, C_SKIP, 2 * D, 2 * H, 2 * W), dtype=jnp.float32)
    # ConvTranspose3d weight layout: (in_channels, out_channels, kD, kH, kW)
    weight = 0.1 * jax.random.normal(k3, (C_IN, C_OUT, 2, 2, 2), dtype=jnp.float32)
    bias = 0.1 * jax.random.normal(k4, (C_OUT,), dtype=jnp.float32)

    ref = jax.block_until_ready(_reference_upconv(skip, x, weight, bias))
    out_shape = (N, C_SKIP + C_OUT, 2 * D, 2 * H, 2 * W)

    # Exact path: f32 matmul inputs (tight tolerance vs reference).
    out_f32 = jax.block_until_ready(
        up_conv(skip, x, weight, bias, compute_dtype=jnp.float32))
    assert out_f32.shape == out_shape, out_f32.shape
    assert jnp.allclose(out_f32, ref, atol=1e-5, rtol=1e-5), "f32 mismatch vs reference"

    # Default path: bf16 MXU inputs, f32 accumulation, f32 output.
    out_def = jax.block_until_ready(up_conv(skip, x, weight, bias))
    assert out_def.shape == out_shape and out_def.dtype == jnp.float32
    assert jnp.allclose(out_def, ref, atol=5e-2, rtol=5e-2), "bf16-compute mismatch"

    # Reduced-writeback path: bf16 output (halves the dominant HBM writeback).
    out_bf = jax.block_until_ready(
        up_conv(skip, x, weight, bias, out_dtype=jnp.bfloat16))
    assert out_bf.shape == out_shape and out_bf.dtype == jnp.bfloat16
    assert jnp.allclose(out_bf.astype(jnp.float32), ref, atol=1e-1, rtol=1e-1), \
        "bf16-output mismatch"

    # Fallback matmul path (only used if the fused kernel fails to lower).
    out_fb = jax.block_until_ready(
        _up_conv_matmul(skip, x, weight, bias,
                        compute_dtype=jnp.dtype(jnp.float32),
                        out_dtype=jnp.dtype(jnp.float32)))
    assert jnp.allclose(out_fb, ref, atol=1e-5, rtol=1e-5), "fallback mismatch"

    print("KERNEL_OK")
</pallas_src>

<mosaic_0001>
module attributes {stable_mosaic.version = 11 : i64} {
  func.func @_upconv_fused_kernel(%arg0: i32, %arg1: i32, %arg2: i32, %arg3: memref<1x8x1x8x8xf32, #tpu.memory_space<vmem>>, %arg4: memref<1x8x1x2x256xf32, #tpu.memory_space<vmem>>, %arg5: memref<64x8xf32, #tpu.memory_space<vmem>>, %arg6: memref<64x1xf32, #tpu.memory_space<vmem>>, %arg7: memref<1x16x1x2x256xf32, #tpu.memory_space<vmem>>) attributes {dimension_semantics = [#tpu.dimension_semantics<parallel>, #tpu.dimension_semantics<parallel>, #tpu.dimension_semantics<parallel>], iteration_bounds = array<i64: 2, 8, 1>, scalar_prefetch = 0 : i64, scratch_operands = 0 : i64, tpu.core_type = #tpu.core_type<tc>, window_params = [{transform_indices = @transform_0, window_bounds = array<i64: 1, 8, 1, 8, 8>}, {transform_indices = @transform_1, window_bounds = array<i64: 1, 8, 1, 2, 256>}, {pipeline_mode = #tpu.pipeline_mode<synchronous>, transform_indices = @transform_2, window_bounds = array<i64: 64, 8>}, {pipeline_mode = #tpu.pipeline_mode<synchronous>, transform_indices = @transform_3, window_bounds = array<i64: 64, 1>}, {transform_indices = @transform_4, window_bounds = array<i64: 1, 16, 1, 2, 256>}]} {
    %c0 = arith.constant 0 : index
    %c0_0 = arith.constant 0 : index
    %c0_1 = arith.constant 0 : index
    %c0_2 = arith.constant 0 : index
    %c0_3 = arith.constant 0 : index
    %0 = vector.load %arg4[%c0, %c0_0, %c0_1, %c0_2, %c0_3] : memref<1x8x1x2x256xf32, #tpu.memory_space<vmem>>, vector<1x8x1x2x256xf32>
    %1 = vector.shape_cast %0 : vector<1x8x1x2x256xf32> to vector<8x2x256xf32>
    %c0_4 = arith.constant 0 : index
    %c0_5 = arith.constant 0 : index
    %c0_6 = arith.constant 0 : index
    %c0_7 = arith.constant 0 : index
    %c0_8 = arith.constant 0 : index
    %2 = vector.load %arg7[%c0_4, %c0_5, %c0_6, %c0_7, %c0_8] : memref<1x16x1x2x256xf32, #tpu.memory_space<vmem>>, vector<1x8x1x2x256xf32>
    %3 = vector.shape_cast %2 : vector<1x8x1x2x256xf32> to vector<8x2x256xf32>
    %4 = vector.shape_cast %1 : vector<8x2x256xf32> to vector<1x8x1x2x256xf32>
    tpu.vector_store %arg7[%c0_4, %c0_5, %c0_6, %c0_7, %c0_8], %4 {strides = array<i32>} : memref<1x16x1x2x256xf32, #tpu.memory_space<vmem>>, vector<1x8x1x2x256xf32>,
    %c0_9 = arith.constant 0 : index
    %c0_10 = arith.constant 0 : index
    %c0_11 = arith.constant 0 : index
    %c0_12 = arith.constant 0 : index
    %c0_13 = arith.constant 0 : index
    %5 = vector.load %arg3[%c0_9, %c0_10, %c0_11, %c0_12, %c0_13] : memref<1x8x1x8x8xf32, #tpu.memory_space<vmem>>, vector<1x8x1x8x8xf32>
    %6 = vector.shape_cast %5 : vector<1x8x1x8x8xf32> to vector<8x8x8xf32>
    %7 = vector.shape_cast %6 : vector<8x8x8xf32> to vector<8x64xf32>
    %c0_14 = arith.constant 0 : index
    %c0_15 = arith.constant 0 : index
    %8 = vector.load %arg5[%c0_14, %c0_15] : memref<64x8xf32, #tpu.memory_space<vmem>>, vector<64x8xf32>
    %cst = arith.constant dense<0.000000e+00> : vector<64x64xf32>
    %9 = tpu.matmul %8, %7, %cst {dimension_numbers = #tpu.dot_dimension_numbers<[1], [0], [0], [1], [0, 0, 1, 1], [], []>} : vector<64x8xf32>, vector<8x64xf32>, vector<64x64xf32> -> vector<64x64xf32>
    %c0_16 = arith.constant 0 : index
    %c0_17 = arith.constant 0 : index
    %10 = vector.load %arg6[%c0_16, %c0_17] : memref<64x1xf32, #tpu.memory_space<vmem>>, vector<64x1xf32>
    %11 = vector.broadcast %10 : vector<64x1xf32> to vector<64x64xf32>
    %12 = arith.addf %9, %11 : vector<64x64xf32>
    %13 = vector.extract_strided_slice %12 {offsets = [0, 0], sizes = [8, 64], strides = [1, 1]} : vector<64x64xf32> to vector<8x64xf32>
    %14 = vector.extract_strided_slice %12 {offsets = [8, 0], sizes = [8, 64], strides = [1, 1]} : vector<64x64xf32> to vector<8x64xf32>
    %15 = vector.shape_cast %13 : vector<8x64xf32> to vector<8x64x1xf32>
    %16 = vector.shape_cast %14 : vector<8x64xf32> to vector<8x64x1xf32>
    %17 = tpu.concatenate %15, %16 in 2 : vector<8x64x1xf32>, vector<8x64x1xf32> -> vector<8x64x2xf32>
    %18 = vector.shape_cast %17 : vector<8x64x2xf32> to vector<64x16xf32>
    %19 = vector.extract_strided_slice %12 {offsets = [16, 0], sizes = [8, 64], strides = [1, 1]} : vector<64x64xf32> to vector<8x64xf32>
    %20 = vector.extract_strided_slice %12 {offsets = [24, 0], sizes = [8, 64], strides = [1, 1]} : vector<64x64xf32> to vector<8x64xf32>
    %21 = vector.shape_cast %19 : vector<8x64xf32> to vector<8x64x1xf32>
    %22 = vector.shape_cast %20 : vector<8x64xf32> to vector<8x64x1xf32>
    %23 = tpu.concatenate %21, %22 in 2 : vector<8x64x1xf32>, vector<8x64x1xf32> -> vector<8x64x2xf32>
    %24 = vector.shape_cast %23 : vector<8x64x2xf32> to vector<64x16xf32>
    %25 = vector.shape_cast %18 : vector<64x16xf32> to vector<64x1x16xf32>
    %26 = vector.shape_cast %24 : vector<64x16xf32> to vector<64x1x16xf32>
    %27 = tpu.concatenate %25, %26 in 1 : vector<64x1x16xf32>, vector<64x1x16xf32> -> vector<64x2x16xf32>
    %28 = vector.shape_cast %27 : vector<64x2x16xf32> to vector<8x256xf32>
    %c0_18 = arith.constant 0 : index
    %c8 = arith.constant 8 : index
    %c0_19 = arith.constant 0 : index
    %c0_20 = arith.constant 0 : index
    %c0_21 = arith.constant 0 : index
    %29 = vector.load %arg7[%c0_18, %c8, %c0_19, %c0_20, %c0_21] : memref<1x16x1x2x256xf32, #tpu.memory_space<vmem>>, vector<1x8x1x1x256xf32>
    %30 = vector.shape_cast %29 : vector<1x8x1x1x256xf32> to vector<8x256xf32>
    %31 = vector.shape_cast %28 : vector<8x256xf32> to vector<1x8x1x1x256xf32>
    tpu.vector_store %arg7[%c0_18, %c8, %c0_19, %c0_20, %c0_21], %31 {strides = array<i32>} : memref<1x16x1x2x256xf32, #tpu.memory_space<vmem>>, vector<1x8x1x1x256xf32>,
    %32 = vector.extract_strided_slice %12 {offsets = [32, 0], sizes = [8, 64], strides = [1, 1]} : vector<64x64xf32> to vector<8x64xf32>
    %33 = vector.extract_strided_slice %12 {offsets = [40, 0], sizes = [8, 64], strides = [1, 1]} : vector<64x64xf32> to vector<8x64xf32>
    %34 = vector.shape_cast %32 : vector<8x64xf32> to vector<8x64x1xf32>
    %35 = vector.shape_cast %33 : vector<8x64xf32> to vector<8x64x1xf32>
    %36 = tpu.concatenate %34, %35 in 2 : vector<8x64x1xf32>, vector<8x64x1xf32> -> vector<8x64x2xf32>
    %37 = vector.shape_cast %36 : vector<8x64x2xf32> to vector<64x16xf32>
    %38 = vector.extract_strided_slice %12 {offsets = [48, 0], sizes = [8, 64], strides = [1, 1]} : vector<64x64xf32> to vector<8x64xf32>
    %39 = vector.extract_strided_slice %12 {offsets = [56, 0], sizes = [8, 64], strides = [1, 1]} : vector<64x64xf32> to vector<8x64xf32>
    %40 = vector.shape_cast %38 : vector<8x64xf32> to vector<8x64x1xf32>
    %41 = vector.shape_cast %39 : vector<8x64xf32> to vector<8x64x1xf32>
    %42 = tpu.concatenate %40, %41 in 2 : vector<8x64x1xf32>, vector<8x64x1xf32> -> vector<8x64x2xf32>
    %43 = vector.shape_cast %42 : vector<8x64x2xf32> to vector<64x16xf32>
    %44 = vector.shape_cast %37 : vector<64x16xf32> to vector<64x1x16xf32>
    %45 = vector.shape_cast %43 : vector<64x16xf32> to vector<64x1x16xf32>
    %46 = tpu.concatenate %44, %45 in 1 : vector<64x1x16xf32>, vector<64x1x16xf32> -> vector<64x2x16xf32>
    %47 = vector.shape_cast %46 : vector<64x2x16xf32> to vector<8x256xf32>
    %c0_22 = arith.constant 0 : index
    %c8_23 = arith.constant 8 : index
    %c0_24 = arith.constant 0 : index
    %c1 = arith.constant 1 : index
    %c0_25 = arith.constant 0 : index
    %48 = vector.load %arg7[%c0_22, %c8_23, %c0_24, %c1, %c0_25] : memref<1x16x1x2x256xf32, #tpu.memory_space<vmem>>, vector<1x8x1x1x256xf32>
    %49 = vector.shape_cast %48 : vector<1x8x1x1x256xf32> to vector<8x256xf32>
    %50 = vector.shape_cast %47 : vector<8x256xf32> to vector<1x8x1x1x256xf32>
    tpu.vector_store %arg7[%c0_22, %c8_23, %c0_24, %c1, %c0_25], %50 {strides = array<i32>} : memref<1x16x1x2x256xf32, #tpu.memory_space<vmem>>, vector<1x8x1x1x256xf32>,
    return
  }
  func.func @transform_0(%arg0: i32, %arg1: i32, %arg2: i32) -> (i32, i32, i32, i32, i32) {
    %c0_i32 = arith.constant 0 : i32
    %c0_i32_0 = arith.constant 0 : i32
    %c0_i32_1 = arith.constant 0 : i32
    return %arg0, %c0_i32, %arg1, %arg2, %c0_i32_0 : i32, i32, i32, i32, i32
  }
  func.func @transform_1(%arg0: i32, %arg1: i32, %arg2: i32) -> (i32, i32, i32, i32, i32) {
    %c0_i32 = arith.constant 0 : i32
    %c0_i32_0 = arith.constant 0 : i32
    %c0_i32_1 = arith.constant 0 : i32
    return %arg0, %c0_i32, %arg1, %c0_i32_0, %arg2 : i32, i32, i32, i32, i32
  }
  func.func @transform_2(%arg0: i32, %arg1: i32, %arg2: i32) -> (i32, i32) {
    %c0_i32 = arith.constant 0 : i32
    %c0_i32_0 = arith.constant 0 : i32
    %c0_i32_1 = arith.constant 0 : i32
    return %c0_i32, %c0_i32_0 : i32, i32
  }
  func.func @transform_3(%arg0: i32, %arg1: i32, %arg2: i32) -> (i32, i32) {
    %c0_i32 = arith.constant 0 : i32
    %c0_i32_0 = arith.constant 0 : i32
    %c0_i32_1 = arith.constant 0 : i32
    return %c0_i32, %c0_i32_0 : i32, i32
  }
  func.func @transform_4(%arg0: i32, %arg1: i32, %arg2: i32) -> (i32, i32, i32, i32, i32) {
    %c0_i32 = arith.constant 0 : i32
    %c0_i32_0 = arith.constant 0 : i32
    %c0_i32_1 = arith.constant 0 : i32
    return %arg0, %c0_i32, %arg1, %c0_i32_0, %arg2 : i32, i32, i32, i32, i32
  }
}

module attributes {stable_mosaic.version = 11 : i64} {
  func.func @_upconv_fused_kernel(%arg0: i32, %arg1: i32, %arg2: i32, %arg3: memref<1x8x1x8x8xf32, #tpu.memory_space<vmem>>, %arg4: memref<1x8x1x2x256xf32, #tpu.memory_space<vmem>>, %arg5: memref<64x8xf32, #tpu.memory_space<vmem>>, %arg6: memref<64x1xf32, #tpu.memory_space<vmem>>, %arg7: memref<1x16x1x2x256xf32, #tpu.memory_space<vmem>>) attributes {dimension_semantics = [#tpu.dimension_semantics<parallel>, #tpu.dimension_semantics<parallel>, #tpu.dimension_semantics<parallel>], iteration_bounds = array<i64: 2, 8, 1>, scalar_prefetch = 0 : i64, scratch_operands = 0 : i64, tpu.core_type = #tpu.core_type<tc>, window_params = [{transform_indices = @transform_0, window_bounds = array<i64: 1, 8, 1, 8, 8>}, {transform_indices = @transform_1, window_bounds = array<i64: 1, 8, 1, 2, 256>}, {pipeline_mode = #tpu.pipeline_mode<synchronous>, transform_indices = @transform_2, window_bounds = array<i64: 64, 8>}, {pipeline_mode = #tpu.pipeline_mode<synchronous>, transform_indices = @transform_3, window_bounds = array<i64: 64, 1>}, {transform_indices = @transform_4, window_bounds = array<i64: 1, 16, 1, 2, 256>}]} {
    %c0 = arith.constant 0 : index
    %c0_0 = arith.constant 0 : index
    %c0_1 = arith.constant 0 : index
    %c0_2 = arith.constant 0 : index
    %c0_3 = arith.constant 0 : index
    %0 = vector.load %arg4[%c0, %c0_0, %c0_1, %c0_2, %c0_3] : memref<1x8x1x2x256xf32, #tpu.memory_space<vmem>>, vector<1x8x1x2x256xf32>
    %1 = vector.shape_cast %0 : vector<1x8x1x2x256xf32> to vector<8x2x256xf32>
    %c0_4 = arith.constant 0 : index
    %c0_5 = arith.constant 0 : index
    %c0_6 = arith.constant 0 : index
    %c0_7 = arith.constant 0 : index
    %c0_8 = arith.constant 0 : index
    %2 = vector.load %arg7[%c0_4, %c0_5, %c0_6, %c0_7, %c0_8] : memref<1x16x1x2x256xf32, #tpu.memory_space<vmem>>, vector<1x8x1x2x256xf32>
    %3 = vector.shape_cast %2 : vector<1x8x1x2x256xf32> to vector<8x2x256xf32>
    %4 = vector.shape_cast %1 : vector<8x2x256xf32> to vector<1x8x1x2x256xf32>
    tpu.vector_store %arg7[%c0_4, %c0_5, %c0_6, %c0_7, %c0_8], %4 {strides = array<i32>} : memref<1x16x1x2x256xf32, #tpu.memory_space<vmem>>, vector<1x8x1x2x256xf32>,
    %c0_9 = arith.constant 0 : index
    %c0_10 = arith.constant 0 : index
    %c0_11 = arith.constant 0 : index
    %c0_12 = arith.constant 0 : index
    %c0_13 = arith.constant 0 : index
    %5 = vector.load %arg3[%c0_9, %c0_10, %c0_11, %c0_12, %c0_13] : memref<1x8x1x8x8xf32, #tpu.memory_space<vmem>>, vector<1x8x1x8x8xf32>
    %6 = vector.shape_cast %5 : vector<1x8x1x8x8xf32> to vector<8x8x8xf32>
    %7 = vector.shape_cast %6 : vector<8x8x8xf32> to vector<8x64xf32>
    %c0_14 = arith.constant 0 : index
    %c0_15 = arith.constant 0 : index
    %8 = vector.load %arg5[%c0_14, %c0_15] : memref<64x8xf32, #tpu.memory_space<vmem>>, vector<64x8xf32>
    %cst = arith.constant dense<0.000000e+00> : vector<64x64xf32>
    %9 = tpu.matmul %8, %7, %cst {dimension_numbers = #tpu.dot_dimension_numbers<[1], [0], [0], [1], [0, 0, 1, 1], [], []>} : vector<64x8xf32>, vector<8x64xf32>, vector<64x64xf32> -> vector<64x64xf32>
    %c0_16 = arith.constant 0 : index
    %c0_17 = arith.constant 0 : index
    %10 = vector.load %arg6[%c0_16, %c0_17] : memref<64x1xf32, #tpu.memory_space<vmem>>, vector<64x1xf32>
    %11 = vector.broadcast %10 : vector<64x1xf32> to vector<64x64xf32>
    %12 = arith.addf %9, %11 : vector<64x64xf32>
    %13 = vector.extract_strided_slice %12 {offsets = [0, 0], sizes = [8, 64], strides = [1, 1]} : vector<64x64xf32> to vector<8x64xf32>
    %14 = vector.extract_strided_slice %12 {offsets = [8, 0], sizes = [8, 64], strides = [1, 1]} : vector<64x64xf32> to vector<8x64xf32>
    %15 = vector.shape_cast %13 : vector<8x64xf32> to vector<8x64x1xf32>
    %16 = vector.shape_cast %14 : vector<8x64xf32> to vector<8x64x1xf32>
    %17 = tpu.concatenate %15, %16 in 2 : vector<8x64x1xf32>, vector<8x64x1xf32> -> vector<8x64x2xf32>
    %18 = vector.shape_cast %17 : vector<8x64x2xf32> to vector<64x16xf32>
    %19 = vector.extract_strided_slice %12 {offsets = [16, 0], sizes = [8, 64], strides = [1, 1]} : vector<64x64xf32> to vector<8x64xf32>
    %20 = vector.extract_strided_slice %12 {offsets = [24, 0], sizes = [8, 64], strides = [1, 1]} : vector<64x64xf32> to vector<8x64xf32>
    %21 = vector.shape_cast %19 : vector<8x64xf32> to vector<8x64x1xf32>
    %22 = vector.shape_cast %20 : vector<8x64xf32> to vector<8x64x1xf32>
    %23 = tpu.concatenate %21, %22 in 2 : vector<8x64x1xf32>, vector<8x64x1xf32> -> vector<8x64x2xf32>
    %24 = vector.shape_cast %23 : vector<8x64x2xf32> to vector<64x16xf32>
    %25 = vector.shape_cast %18 : vector<64x16xf32> to vector<64x1x16xf32>
    %26 = vector.shape_cast %24 : vector<64x16xf32> to vector<64x1x16xf32>
    %27 = tpu.concatenate %25, %26 in 1 : vector<64x1x16xf32>, vector<64x1x16xf32> -> vector<64x2x16xf32>
    %28 = vector.shape_cast %27 : vector<64x2x16xf32> to vector<8x256xf32>
    %c0_18 = arith.constant 0 : index
    %c8 = arith.constant 8 : index
    %c0_19 = arith.constant 0 : index
    %c0_20 = arith.constant 0 : index
    %c0_21 = arith.constant 0 : index
    %29 = vector.load %arg7[%c0_18, %c8, %c0_19, %c0_20, %c0_21] : memref<1x16x1x2x256xf32, #tpu.memory_space<vmem>>, vector<1x8x1x1x256xf32>
    %30 = vector.shape_cast %29 : vector<1x8x1x1x256xf32> to vector<8x256xf32>
    %31 = vector.shape_cast %28 : vector<8x256xf32> to vector<1x8x1x1x256xf32>
    tpu.vector_store %arg7[%c0_18, %c8, %c0_19, %c0_20, %c0_21], %31 {strides = array<i32>} : memref<1x16x1x2x256xf32, #tpu.memory_space<vmem>>, vector<1x8x1x1x256xf32>,
    %32 = vector.extract_strided_slice %12 {offsets = [32, 0], sizes = [8, 64], strides = [1, 1]} : vector<64x64xf32> to vector<8x64xf32>
    %33 = vector.extract_strided_slice %12 {offsets = [40, 0], sizes = [8, 64], strides = [1, 1]} : vector<64x64xf32> to vector<8x64xf32>
    %34 = vector.shape_cast %32 : vector<8x64xf32> to vector<8x64x1xf32>
    %35 = vector.shape_cast %33 : vector<8x64xf32> to vector<8x64x1xf32>
    %36 = tpu.concatenate %34, %35 in 2 : vector<8x64x1xf32>, vector<8x64x1xf32> -> vector<8x64x2xf32>
    %37 = vector.shape_cast %36 : vector<8x64x2xf32> to vector<64x16xf32>
    %38 = vector.extract_strided_slice %12 {offsets = [48, 0], sizes = [8, 64], strides = [1, 1]} : vector<64x64xf32> to vector<8x64xf32>
    %39 = vector.extract_strided_slice %12 {offsets = [56, 0], sizes = [8, 64], strides = [1, 1]} : vector<64x64xf32> to vector<8x64xf32>
    %40 = vector.shape_cast %38 : vector<8x64xf32> to vector<8x64x1xf32>
    %41 = vector.shape_cast %39 : vector<8x64xf32> to vector<8x64x1xf32>
    %42 = tpu.concatenate %40, %41 in 2 : vector<8x64x1xf32>, vector<8x64x1xf32> -> vector<8x64x2xf32>
    %43 = vector.shape_cast %42 : vector<8x64x2xf32> to vector<64x16xf32>
    %44 = vector.shape_cast %37 : vector<64x16xf32> to vector<64x1x16xf32>
    %45 = vector.shape_cast %43 : vector<64x16xf32> to vector<64x1x16xf32>
    %46 = tpu.concatenate %44, %45 in 1 : vector<64x1x16xf32>, vector<64x1x16xf32> -> vector<64x2x16xf32>
    %47 = vector.shape_cast %46 : vector<64x2x16xf32> to vector<8x256xf32>
    %c0_22 = arith.constant 0 : index
    %c8_23 = arith.constant 8 : index
    %c0_24 = arith.constant 0 : index
    %c1 = arith.constant 1 : index
    %c0_25 = arith.constant 0 : index
    %48 = vector.load %arg7[%c0_22, %c8_23, %c0_24, %c1, %c0_25] : memref<1x16x1x2x256xf32, #tpu.memory_space<vmem>>, vector<1x8x1x1x256xf32>
    %49 = vector.shape_cast %48 : vector<1x8x1x1x256xf32> to vector<8x256xf32>
    %50 = vector.shape_cast %47 : vector<8x256xf32> to vector<1x8x1x1x256xf32>
    tpu.vector_store %arg7[%c0_22, %c8_23, %c0_24, %c1, %c0_25], %50 {strides = array<i32>} : memref<1x16x1x2x256xf32, #tpu.memory_space<vmem>>, vector<1x8x1x1x256xf32>,
    return
  }
  func.func @transform_0(%arg0: i32, %arg1: i32, %arg2: i32) -> (i32, i32, i32, i32, i32) {
    %c0_i32 = arith.constant 0 : i32
    %c0_i32_0 = arith.constant 0 : i32
    %c0_i32_1 = arith.constant 0 : i32
    return %arg0, %c0_i32, %arg1, %arg2, %c0_i32_0 : i32, i32, i32, i32, i32
  }
  func.func @transform_1(%arg0: i32, %arg1: i32, %arg2: i32) -> (i32, i32, i32, i32, i32) {
    %c0_i32 = arith.constant 0 : i32
    %c0_i32_0 = arith.constant 0 : i32
    %c0_i32_1 = arith.constant 0 : i32
    return %arg0, %c0_i32, %arg1, %c0_i32_0, %arg2 : i32, i32, i32, i32, i32
  }
  func.func @transform_2(%arg0: i32, %arg1: i32, %arg2: i32) -> (i32, i32) {
    %c0_i32 = arith.constant 0 : i32
    %c0_i32_0 = arith.constant 0 : i32
    %c0_i32_1 = arith.constant 0 : i32
    return %c0_i32, %c0_i32_0 : i32, i32
  }
  func.func @transform_3(%arg0: i32, %arg1: i32, %arg2: i32) -> (i32, i32) {
    %c0_i32 = arith.constant 0 : i32
    %c0_i32_0 = arith.constant 0 : i32
    %c0_i32_1 = arith.constant 0 : i32
    return %c0_i32, %c0_i32_0 : i32, i32
  }
  func.func @transform_4(%arg0: i32, %arg1: i32, %arg2: i32) -> (i32, i32, i32, i32, i32) {
    %c0_i32 = arith.constant 0 : i32
    %c0_i32_0 = arith.constant 0 : i32
    %c0_i32_1 = arith.constant 0 : i32
    return %arg0, %c0_i32, %arg1, %c0_i32_0, %arg2 : i32, i32, i32, i32, i32
  }
}

module attributes {stable_mosaic.version = 11 : i64} {
  func.func @_matmul_kernel(%arg0: i32, %arg1: memref<512x8xf32, #tpu.memory_space<vmem>>, %arg2: memref<8x128xf32, #tpu.memory_space<vmem>>, %arg3: memref<1x128xf32, #tpu.memory_space<vmem>>, %arg4: memref<512x128xf32, #tpu.memory_space<vmem>>) attributes {dimension_semantics = [#tpu.dimension_semantics<parallel>], iteration_bounds = array<i64: 2>, scalar_prefetch = 0 : i64, scratch_operands = 0 : i64, tpu.core_type = #tpu.core_type<tc>, window_params = [{transform_indices = @transform_0, window_bounds = array<i64: 512, 8>}, {pipeline_mode = #tpu.pipeline_mode<synchronous>, transform_indices = @transform_1, window_bounds = array<i64: 8, 128>}, {pipeline_mode = #tpu.pipeline_mode<synchronous>, transform_indices = @transform_2, window_bounds = array<i64: 1, 128>}, {transform_indices = @transform_3, window_bounds = array<i64: 512, 128>}]} {
    %c0 = arith.constant 0 : index
    %c0_0 = arith.constant 0 : index
    %0 = vector.load %arg1[%c0, %c0_0] : memref<512x8xf32, #tpu.memory_space<vmem>>, vector<512x8xf32>
    %c0_1 = arith.constant 0 : index
    %c0_2 = arith.constant 0 : index
    %1 = vector.load %arg2[%c0_1, %c0_2] : memref<8x128xf32, #tpu.memory_space<vmem>>, vector<8x128xf32>
    %cst = arith.constant dense<0.000000e+00> : vector<512x128xf32>
    %2 = tpu.matmul %0, %1, %cst {dimension_numbers = #tpu.dot_dimension_numbers<[1], [0], [0], [1], [0, 0, 1, 1], [], []>} : vector<512x8xf32>, vector<8x128xf32>, vector<512x128xf32> -> vector<512x128xf32>
    %c0_3 = arith.constant 0 : index
    %c0_4 = arith.constant 0 : index
    %3 = vector.load %arg3[%c0_3, %c0_4] : memref<1x128xf32, #tpu.memory_space<vmem>>, vector<1x128xf32>
    %4 = vector.broadcast %3 : vector<1x128xf32> to vector<512x128xf32>
    %5 = arith.addf %2, %4 : vector<512x128xf32>
    %c0_5 = arith.constant 0 : index
    %c0_6 = arith.constant 0 : index
    %6 = vector.load %arg4[%c0_5, %c0_6] : memref<512x128xf32, #tpu.memory_space<vmem>>, vector<512x128xf32>
    tpu.vector_store %arg4[%c0_5, %c0_6], %5 {strides = array<i32>} : memref<512x128xf32, #tpu.memory_space<vmem>>, vector<512x128xf32>,
    return
  }
  func.func @transform_0(%arg0: i32) -> (i32, i32) {
    %c0_i32 = arith.constant 0 : i32
    %c0_i32_0 = arith.constant 0 : i32
    return %arg0, %c0_i32 : i32, i32
  }
  func.func @transform_1(%arg0: i32) -> (i32, i32) {
    %c0_i32 = arith.constant 0 : i32
    %c0_i32_0 = arith.constant 0 : i32
    %c0_i32_1 = arith.constant 0 : i32
    return %c0_i32, %c0_i32_0 : i32, i32
  }
  func.func @transform_2(%arg0: i32) -> (i32, i32) {
    %c0_i32 = arith.constant 0 : i32
    %c0_i32_0 = arith.constant 0 : i32
    %c0_i32_1 = arith.constant 0 : i32
    return %c0_i32, %c0_i32_0 : i32, i32
  }
  func.func @transform_3(%arg0: i32) -> (i32, i32) {
    %c0_i32 = arith.constant 0 : i32
    %c0_i32_0 = arith.constant 0 : i32
    return %arg0, %c0_i32 : i32, i32
  }
}

</mosaic_0001>

<bundles_post_ra>
// kernel: tile.0
= control target key start
LH: loop header
LB: loop body
LE: loop exit
PB: predicated region body
PF: predicated region fallthrough
CT: control target
= control target key end

     0   :  { %vm3_vm0 = vcmask 7168   ;;  %s84_s8 = smov 125   ;;  %s85_s13 = smov 126   ;;  %s167_s0 = inlined_call_operand.vmem [shape: f32[8,8], index: 0, kind: input, shape index: {}]   ;;  %s168_s1 = inlined_call_operand.vmem [shape: f32[64,1], index: 1, kind: output, shape index: {}]  }
   0x1   :  { %v6_v0 = vld [vmem:[%s167_s0] sm:$0xff]   ;;  %s83_s0 = smov 127   ;;  %s86_s14 = smov 124  }
   0x2   :  { %7 = vrot.lane.b32.xlu0 %v6_v0, %s83_s0  ;;  %23 = vrot.lane.b32.xlu1 %v6_v0, %s84_s8  ;;  %4 = vst.msk [vmem:[%s168_s1] ss:$8 sm:$0xf] %vm3_vm0, %v6_v0   ;;  %5 = vst.msk [vmem:[%s168_s1] ss:$8 sm:$0xf0] %vm3_vm0, %v6_v0  }
   0x3   :  { %s87_s15 = smov 123   ;;  %s88_s16 = smov 122  }
   0x4   :  { %s89_s17 = smov 121  }
   0x6   :  { %15 = vrot.lane.b32.xlu0 %v6_v0, %s85_s13  ;;  %31 = vrot.lane.b32.xlu1 %v6_v0, %s86_s14 }
   0xa   :  { %39 = vrot.lane.b32.xlu0 %v6_v0, %s87_s15  ;;  %47 = vrot.lane.b32.xlu1 %v6_v0, %s88_s16 }
   0xe   :  { %55 = vrot.lane.b32.xlu0 %v6_v0, %s89_s17 }
  0x74   :  { %v8_v1 = vpop.permute.xlu0 %7   ;;  %v24_v2 = vpop.permute.xlu1 %23  }
  0x75   :  { %62 = vst.msk [vmem:[%s168_s1 + $0x1] ss:$8 sm:$0xf] %vm3_vm0, %v8_v1   ;;  %63 = vst.msk [vmem:[%s168_s1 + $0x1] ss:$8 sm:$0xf0] %vm3_vm0, %v8_v1  }
  0x76   :  { %66 = vst.msk [vmem:[%s168_s1 + $0x3] ss:$8 sm:$0xf] %vm3_vm0, %v24_v2   ;;  %67 = vst.msk [vmem:[%s168_s1 + $0x3] ss:$8 sm:$0xf0] %vm3_vm0, %v24_v2  }
  0x78   :  { %v16_v3 = vpop.permute.xlu0 %15   ;;  %v32_v4 = vpop.permute.xlu1 %31  }
  0x79   :  { %64 = vst.msk [vmem:[%s168_s1 + $0x2] ss:$8 sm:$0xf] %vm3_vm0, %v16_v3   ;;  %65 = vst.msk [vmem:[%s168_s1 + $0x2] ss:$8 sm:$0xf0] %vm3_vm0, %v16_v3  }
  0x7a   :  { %68 = vst.msk [vmem:[%s168_s1 + $0x4] ss:$8 sm:$0xf] %vm3_vm0, %v32_v4   ;;  %69 = vst.msk [vmem:[%s168_s1 + $0x4] ss:$8 sm:$0xf0] %vm3_vm0, %v32_v4  }
  0x7c   :  { %v40_v5 = vpop.permute.xlu0 %39   ;;  %v48_v6 = vpop.permute.xlu1 %47  }
  0x7d   :  { %70 = vst.msk [vmem:[%s168_s1 + $0x5] ss:$8 sm:$0xf] %vm3_vm0, %v40_v5   ;;  %71 = vst.msk [vmem:[%s168_s1 + $0x5] ss:$8 sm:$0xf0] %vm3_vm0, %v40_v5  }
  0x7e   :  { %72 = vst.msk [vmem:[%s168_s1 + $0x6] ss:$8 sm:$0xf] %vm3_vm0, %v48_v6   ;;  %73 = vst.msk [vmem:[%s168_s1 + $0x6] ss:$8 sm:$0xf0] %vm3_vm0, %v48_v6  }
  0x80   :  { %v56_v7 = vpop.permute.xlu0 %55  }
  0x81   :  { %74 = vst.msk [vmem:[%s168_s1 + $0x7] ss:$8 sm:$0xf] %vm3_vm0, %v56_v7   ;;  %75 = vst.msk [vmem:[%s168_s1 + $0x7] ss:$8 sm:$0xf0] %vm3_vm0, %v56_v7  }

// kernel: tile.8
= control target key start
LH: loop header
LB: loop body
LE: loop exit
PB: predicated region body
PF: predicated region fallthrough
CT: control target
= control target key end

     0   :  { %2 = vsyncpa [#allocation1], 0  ;;  %s44_s6 = smov [#allocation0]   ;;  %s70_s0 = inlined_call_operand.hbm [shape: f32[8], index: 0, kind: input, shape index: {}]   ;;  %s71_s1 = inlined_call_operand.vmem [shape: f32[8,8], index: 1, kind: output, shape index: {}]  }
   0x1   :  { %s9_s7 = sshll.u32 %s44_s6, 4  ;;  %s20_s10 = scalar_lea.hbm %s70_s0, 16  ;;  %s10_s7 = int_to_ptr.vmem [resolvable:$true] %s9_s7 }
   0x2   :  { %p21_p0 = scmp.ne.s32.totalorder %s70_s0, %s20_s10  ;;  %p24_p1 = scmp.lt.u32.totalorder %s20_s10, %s70_s0 }
   0x4   :  { %p26_p2 = pnand %p24_p1, %p21_p0 }
   0x6   :  { %29 = shalt.err (!%p26_p2)
}
   0x7   :  { %s30_s15 = scalar_lea.vmem %s10_s7, 16  ;;  %s34_s16 = scalar_lea.vmem %s10_s7, 32 }
   0x8   :  { %p31_p3 = scmp.ne.s32.totalorder %s10_s7, %s30_s15  ;;  %p35_p4 = scmp.lt.s32.totalorder %s10_s7, %s10_s7 }
   0x9   :  { %p36_p5 = scmp.lt.s32.totalorder %s34_s16, %s30_s15 }
   0xb   :  { %p37_p6 = por %p36_p5, %p35_p4 }
   0xd   :  { %p38_p7 = pnand %p37_p6, %p31_p3 }
   0xf   :  { %41 = shalt.err (!%p38_p7)
}
  0x10   :  { %12 = dma.hbm_to_vmem [thread:$0]  %s70_s0, 16, %s10_s7, [#allocation1]  }
  0x11   :  { %42 = dma.done.wait [#allocation1], 16  }
  0x12   :  { %43 = vsyncadd [#allocation1], 4294967280  ;;  %v16_v0 = vld [vmem:[#allocation0] ss:$0 sm:$0xff] }
  0x13   :  { %17 = vst [vmem:[%s71_s1] sm:$0xff] %v16_v0 }
  0x14   :  { %18 = vsyncpa [#allocation1], 1 }

// kernel: tile.8
= control target key start
LH: loop header
LB: loop body
LE: loop exit
PB: predicated region body
PF: predicated region fallthrough
CT: control target
= control target key end

     0   :  { %2 = vsyncpa [#allocation1], 0  ;;  %s44_s6 = smov [#allocation0]   ;;  %s70_s0 = inlined_call_operand.hbm [shape: f32[8], index: 0, kind: input, shape index: {}]   ;;  %s71_s1 = inlined_call_operand.vmem [shape: f32[8,8], index: 1, kind: output, shape index: {}]  }
   0x1   :  { %s9_s7 = sshll.u32 %s44_s6, 4  ;;  %s20_s10 = scalar_lea.hbm %s70_s0, 16  ;;  %s10_s7 = int_to_ptr.vmem [resolvable:$true] %s9_s7 }
   0x2   :  { %p21_p0 = scmp.ne.s32.totalorder %s70_s0, %s20_s10  ;;  %p24_p1 = scmp.lt.u32.totalorder %s20_s10, %s70_s0 }
   0x4   :  { %p26_p2 = pnand %p24_p1, %p21_p0 }
   0x6   :  { %29 = shalt.err (!%p26_p2)
}
   0x7   :  { %s30_s15 = scalar_lea.vmem %s10_s7, 16  ;;  %s34_s16 = scalar_lea.vmem %s10_s7, 32 }
   0x8   :  { %p31_p3 = scmp.ne.s32.totalorder %s10_s7, %s30_s15  ;;  %p35_p4 = scmp.lt.s32.totalorder %s10_s7, %s10_s7 }
   0x9   :  { %p36_p5 = scmp.lt.s32.totalorder %s34_s16, %s30_s15 }
   0xb   :  { %p37_p6 = por %p36_p5, %p35_p4 }
   0xd   :  { %p38_p7 = pnand %p37_p6, %p31_p3 }
   0xf   :  { %41 = shalt.err (!%p38_p7)
}
  0x10   :  { %12 = dma.hbm_to_vmem [thread:$0]  %s70_s0, 16, %s10_s7, [#allocation1]  }
  0x11   :  { %42 = dma.done.wait [#allocation1], 16  }
  0x12   :  { %43 = vsyncadd [#allocation1], 4294967280  ;;  %v16_v0 = vld [vmem:[#allocation0] ss:$0 sm:$0xff] }
  0x13   :  { %17 = vst [vmem:[%s71_s1] sm:$0xff] %v16_v0 }
  0x14   :  { %18 = vsyncpa [#allocation1], 1 }

// kernel: tile.0
= control target key start
LH: loop header
LB: loop body
LE: loop exit
PB: predicated region body
PF: predicated region fallthrough
CT: control target
= control target key end

     0   :  { %vm3_vm0 = vcmask 7168   ;;  %s84_s8 = smov 125   ;;  %s85_s13 = smov 126   ;;  %s167_s0 = inlined_call_operand.vmem [shape: f32[8,8], index: 0, kind: input, shape index: {}]   ;;  %s168_s1 = inlined_call_operand.vmem [shape: f32[64,1], index: 1, kind: output, shape index: {}]  }
   0x1   :  { %v6_v0 = vld [vmem:[%s167_s0] sm:$0xff]   ;;  %s83_s0 = smov 127   ;;  %s86_s14 = smov 124  }
   0x2   :  { %7 = vrot.lane.b32.xlu0 %v6_v0, %s83_s0  ;;  %23 = vrot.lane.b32.xlu1 %v6_v0, %s84_s8  ;;  %4 = vst.msk [vmem:[%s168_s1] ss:$8 sm:$0xf] %vm3_vm0, %v6_v0   ;;  %5 = vst.msk [vmem:[%s168_s1] ss:$8 sm:$0xf0] %vm3_vm0, %v6_v0  }
   0x3   :  { %s87_s15 = smov 123   ;;  %s88_s16 = smov 122  }
   0x4   :  { %s89_s17 = smov 121  }
   0x6   :  { %15 = vrot.lane.b32.xlu0 %v6_v0, %s85_s13  ;;  %31 = vrot.lane.b32.xlu1 %v6_v0, %s86_s14 }
   0xa   :  { %39 = vrot.lane.b32.xlu0 %v6_v0, %s87_s15  ;;  %47 = vrot.lane.b32.xlu1 %v6_v0, %s88_s16 }
   0xe   :  { %55 = vrot.lane.b32.xlu0 %v6_v0, %s89_s17 }
  0x74   :  { %v8_v1 = vpop.permute.xlu0 %7   ;;  %v24_v2 = vpop.permute.xlu1 %23  }
  0x75   :  { %62 = vst.msk [vmem:[%s168_s1 + $0x1] ss:$8 sm:$0xf] %vm3_vm0, %v8_v1   ;;  %63 = vst.msk [vmem:[%s168_s1 + $0x1] ss:$8 sm:$0xf0] %vm3_vm0, %v8_v1  }
  0x76   :  { %66 = vst.msk [vmem:[%s168_s1 + $0x3] ss:$8 sm:$0xf] %vm3_vm0, %v24_v2   ;;  %67 = vst.msk [vmem:[%s168_s1 + $0x3] ss:$8 sm:$0xf0] %vm3_vm0, %v24_v2  }
  0x78   :  { %v16_v3 = vpop.permute.xlu0 %15   ;;  %v32_v4 = vpop.permute.xlu1 %31  }
  0x79   :  { %64 = vst.msk [vmem:[%s168_s1 + $0x2] ss:$8 sm:$0xf] %vm3_vm0, %v16_v3   ;;  %65 = vst.msk [vmem:[%s168_s1 + $0x2] ss:$8 sm:$0xf0] %vm3_vm0, %v16_v3  }
  0x7a   :  { %68 = vst.msk [vmem:[%s168_s1 + $0x4] ss:$8 sm:$0xf] %vm3_vm0, %v32_v4   ;;  %69 = vst.msk [vmem:[%s168_s1 + $0x4] ss:$8 sm:$0xf0] %vm3_vm0, %v32_v4  }
  0x7c   :  { %v40_v5 = vpop.permute.xlu0 %39   ;;  %v48_v6 = vpop.permute.xlu1 %47  }
  0x7d   :  { %70 = vst.msk [vmem:[%s168_s1 + $0x5] ss:$8 sm:$0xf] %vm3_vm0, %v40_v5   ;;  %71 = vst.msk [vmem:[%s168_s1 + $0x5] ss:$8 sm:$0xf0] %vm3_vm0, %v40_v5  }
  0x7e   :  { %72 = vst.msk [vmem:[%s168_s1 + $0x6] ss:$8 sm:$0xf] %vm3_vm0, %v48_v6   ;;  %73 = vst.msk [vmem:[%s168_s1 + $0x6] ss:$8 sm:$0xf0] %vm3_vm0, %v48_v6  }
  0x80   :  { %v56_v7 = vpop.permute.xlu0 %55  }
  0x81   :  { %74 = vst.msk [vmem:[%s168_s1 + $0x7] ss:$8 sm:$0xf] %vm3_vm0, %v56_v7   ;;  %75 = vst.msk [vmem:[%s168_s1 + $0x7] ss:$8 sm:$0xf0] %vm3_vm0, %v56_v7  }

// kernel: _up_conv_matmul.1
= control target key start
LH: loop header
LB: loop body
LE: loop exit
PB: predicated region body
PF: predicated region fallthrough
CT: control target
= control target key end

     0   :  { %s1221_s12 = smov 0   ;;  %s1513_s0 = inlined_call_operand.vmem [shape: f32[1024,8], index: 0, kind: input, shape index: {}]   ;;  %s1514_s1 = inlined_call_operand.vmem [shape: f32[8,128], index: 1, kind: input, shape index: {}]   ;;  %s1515_s2 = inlined_call_operand.vmem [shape: f32[1,128], index: 2, kind: input, shape index: {}]   ;;  %s1516_s3 = inlined_call_operand.vmem [shape: f32[1024,128], index: 3, kind: output, shape index: {}]  }
   0x1 LB: > { %s944_s13 = sadd.s32 4294967295, %s1199_s12   ;;  %p948_p0 = scmp.ge.s32.totalorder %s1199_s12, 1  ;;  %s1199_s12 = sphi %s1221_s12, %s13_s12  }
   0x2   : > { %p138_p1 = scmp.lt.s32.totalorder %s1199_s12, 3 }
   0x4   : > { %p139_p2 = pnand %p948_p0, %p138_p1 }
   0x5   : > { %v238_v0 = vld [vmem:[%s1514_s1] sm:$0xff] (!%p139_p2)  ;;  %s949_s16 = sshll.u32 (!%p139_p2), %s944_s13, 6  ;;  %vm246_vm0 = vcmask (!%p139_p2), 64512  }
   0x6   : > { %142 = sbr.rel (%p139_p2) target bundleno = 295 (0x127), region = 32  ;;  %1085 = vmatprep.subr.mxu0 (!%p139_p2), %v238_v0  ;;  %1183 = vmatprep.subr.mxu1 (!%p139_p2), %v238_v0  ;;  %p163_p3 = scmp.lt.s32.totalorder (!%p139_p2), %s949_s16, 127 }
   0x7   : > { %1086 = vmatpush3.msra.mxu0 (!%p139_p2), %v238_v0  ;;  %1184 = vmatpush3.msra.mxu1 (!%p139_p2), %v238_v0 }
   0xd   : > { %s1518_s16 = smov (!%p163_p3, %s949_s16), 127 }
   0xe   : > { %s950_s17 = sshll.u32 %s1518_s16, 3 }
   0xf   : > { %s1240_s20 = scalar_lea.vmem %s1513_s0, %s950_s17  ;;  %s1380_s25 = scalar_lea.vmem %s1516_s3, %s950_s17 }
  0x10   : > { %v174_v1 = vld [vmem:[%s1240_s20] sm:$0xff]  ;;  %v175_v3 = vld [vmem:[%s1240_s20 + $0x8] sm:$0xff]  ;;  %v176_v5 = vld [vmem:[%s1240_s20 + $0x10] sm:$0xff] }
  0x11   : > { %v206_v2 = vld [vmem:[%s1240_s20 + $0x100] sm:$0xff]  ;;  %1087 = vmatprep.mubr.msk.f32.mxu0 %vm246_vm0, %v174_v1  ;;  %v207_v4 = vld [vmem:[%s1240_s20 + $0x108] sm:$0xff]  ;;  %v208_v6 = vld [vmem:[%s1240_s20 + $0x110] sm:$0xff] }
  0x12   : > { %1135 = vmatprep.mubr.msk.f32.mxu1 %vm246_vm0, %v206_v2  ;;  %1088 = vmatmul.mubr.msk.f32.vlgmr.msra.gmra.mrb[0].mxu0 %vm246_vm0, %v175_v3  ;;  %v177_v7 = vld [vmem:[%s1240_s20 + $0x18] sm:$0xff]  ;;  %v178_v9 = vld [vmem:[%s1240_s20 + $0x20] sm:$0xff]  ;;  %v179_v11 = vld [vmem:[%s1240_s20 + $0x28] sm:$0xff] }
  0x13   : > { %1136 = vmatmul.mubr.msk.f32.vlgmr.msra.gmra.mrb[0].mxu1 %vm246_vm0, %v207_v4  ;;  %1090 = vmatprep.mubr.msk.f32.mxu0 %vm246_vm0, %v176_v5  ;;  %v209_v8 = vld [vmem:[%s1240_s20 + $0x118] sm:$0xff]  ;;  %v210_v10 = vld [vmem:[%s1240_s20 + $0x120] sm:$0xff]  ;;  %v211_v12 = vld [vmem:[%s1240_s20 + $0x128] sm:$0xff] }
  0x14   : > { %1138 = vmatprep.mubr.msk.f32.mxu1 %vm246_vm0, %v208_v6  ;;  %v180_v13 = vld [vmem:[%s1240_s20 + $0x30] sm:$0xff]  ;;  %v181_v15 = vld [vmem:[%s1240_s20 + $0x38] sm:$0xff]  ;;  %v182_v17 = vld [vmem:[%s1240_s20 + $0x40] sm:$0xff] }
  0x15   : > { %v212_v14 = vld [vmem:[%s1240_s20 + $0x130] sm:$0xff]  ;;  %v213_v16 = vld [vmem:[%s1240_s20 + $0x138] sm:$0xff]  ;;  %v214_v18 = vld [vmem:[%s1240_s20 + $0x140] sm:$0xff] }
  0x16   : > { %1091 = vmatmul.mubr.msk.f32.gmra.mrb[2].mxu0 %vm246_vm0, %v177_v7  ;;  %v183_v19 = vld [vmem:[%s1240_s20 + $0x48] sm:$0xff]  ;;  %v184_v21 = vld [vmem:[%s1240_s20 + $0x50] sm:$0xff]  ;;  %v185_v23 = vld [vmem:[%s1240_s20 + $0x58] sm:$0xff] }
  0x17   : > { %1139 = vmatmul.mubr.msk.f32.gmra.mrb[2].mxu1 %vm246_vm0, %v209_v8  ;;  %1093 = vmatprep.mubr.msk.f32.mxu0 %vm246_vm0, %v178_v9  ;;  %v215_v20 = vld [vmem:[%s1240_s20 + $0x148] sm:$0xff]  ;;  %v216_v22 = vld [vmem:[%s1240_s20 + $0x150] sm:$0xff]  ;;  %v217_v24 = vld [vmem:[%s1240_s20 + $0x158] sm:$0xff] }
  0x18   : > { %1141 = vmatprep.mubr.msk.f32.mxu1 %vm246_vm0, %v210_v10  ;;  %v186_v25 = vld [vmem:[%s1240_s20 + $0x60] sm:$0xff]  ;;  %v187_v27 = vld [vmem:[%s1240_s20 + $0x68] sm:$0xff]  ;;  %v188_v29 = vld [vmem:[%s1240_s20 + $0x70] sm:$0xff] }
  0x19   : > { %v218_v26 = vld [vmem:[%s1240_s20 + $0x160] sm:$0xff]  ;;  %v219_v28 = vld [vmem:[%s1240_s20 + $0x168] sm:$0xff]  ;;  %v220_v30 = vld [vmem:[%s1240_s20 + $0x170] sm:$0xff] }
  0x1a   : > { %1094 = vmatmul.mubr.msk.f32.gmra.mrb[4].mxu0 %vm246_vm0, %v179_v11  ;;  %v189_v31 = vld [vmem:[%s1240_s20 + $0x78] sm:$0xff]  ;;  %v190_v33 = vld [vmem:[%s1240_s20 + $0x80] sm:$0xff]  ;;  %v191_v35 = vld [vmem:[%s1240_s20 + $0x88] sm:$0xff] }
  0x1b   : > { %1142 = vmatmul.mubr.msk.f32.gmra.mrb[4].mxu1 %vm246_vm0, %v211_v12  ;;  %1096 = vmatprep.mubr.msk.f32.mxu0 %vm246_vm0, %v180_v13  ;;  %v221_v32 = vld [vmem:[%s1240_s20 + $0x178] sm:$0xff]  ;;  %v222_v34 = vld [vmem:[%s1240_s20 + $0x180] sm:$0xff]  ;;  %v223_v36 = vld [vmem:[%s1240_s20 + $0x188] sm:$0xff] }
  0x1c   : > { %1144 = vmatprep.mubr.msk.f32.mxu1 %vm246_vm0, %v212_v14  ;;  %v192_v37 = vld [vmem:[%s1240_s20 + $0x90] sm:$0xff]  ;;  %v193_v39 = vld [vmem:[%s1240_s20 + $0x98] sm:$0xff]  ;;  %v194_v41 = vld [vmem:[%s1240_s20 + $0xa0] sm:$0xff] }
  0x1d   : > { %v224_v38 = vld [vmem:[%s1240_s20 + $0x190] sm:$0xff]  ;;  %v225_v40 = vld [vmem:[%s1240_s20 + $0x198] sm:$0xff]  ;;  %v226_v42 = vld [vmem:[%s1240_s20 + $0x1a0] sm:$0xff] }
  0x1e   : > { %1097 = vmatmul.mubr.msk.f32.gmra.mrb[6].mxu0 %vm246_vm0, %v181_v15  ;;  %v195_v43 = vld [vmem:[%s1240_s20 + $0xa8] sm:$0xff]  ;;  %v196_v45 = vld [vmem:[%s1240_s20 + $0xb0] sm:$0xff]  ;;  %v197_v47 = vld [vmem:[%s1240_s20 + $0xb8] sm:$0xff] }
  0x1f   : > { %1145 = vmatmul.mubr.msk.f32.gmra.mrb[6].mxu1 %vm246_vm0, %v213_v16  ;;  %1099 = vmatprep.mubr.msk.f32.mxu0 %vm246_vm0, %v182_v17  ;;  %v227_v44 = vld [vmem:[%s1240_s20 + $0x1a8] sm:$0xff]  ;;  %v228_v46 = vld [vmem:[%s1240_s20 + $0x1b0] sm:$0xff]  ;;  %v229_v48 = vld [vmem:[%s1240_s20 + $0x1b8] sm:$0xff] }
  0x20   : > { %1147 = vmatprep.mubr.msk.f32.mxu1 %vm246_vm0, %v214_v18  ;;  %v198_v49 = vld [vmem:[%s1240_s20 + $0xc0] sm:$0xff]  ;;  %v199_v51 = vld [vmem:[%s1240_s20 + $0xc8] sm:$0xff]  ;;  %v200_v53 = vld [vmem:[%s1240_s20 + $0xd0] sm:$0xff] }
  0x21   : > { %v230_v50 = vld [vmem:[%s1240_s20 + $0x1c0] sm:$0xff]  ;;  %v231_v52 = vld [vmem:[%s1240_s20 + $0x1c8] sm:$0xff]  ;;  %v232_v54 = vld [vmem:[%s1240_s20 + $0x1d0] sm:$0xff] }
  0x22   : > { %1100 = vmatmul.mubr.msk.f32.gmra.mrb[8].mxu0 %vm246_vm0, %v183_v19  ;;  %v201_v55 = vld [vmem:[%s1240_s20 + $0xd8] sm:$0xff]  ;;  %v202_v57 = vld [vmem:[%s1240_s20 + $0xe0] sm:$0xff]  ;;  %v203_v59 = vld [vmem:[%s1240_s20 + $0xe8] sm:$0xff] }
  0x23   : > { %1148 = vmatmul.mubr.msk.f32.gmra.mrb[8].mxu1 %vm246_vm0, %v215_v20  ;;  %1102 = vmatprep.mubr.msk.f32.mxu0 %vm246_vm0, %v184_v21  ;;  %v233_v56 = vld [vmem:[%s1240_s20 + $0x1d8] sm:$0xff]  ;;  %v234_v58 = vld [vmem:[%s1240_s20 + $0x1e0] sm:$0xff]  ;;  %v235_v60 = vld [vmem:[%s1240_s20 + $0x1e8] sm:$0xff] }
  0x24   : > { %1150 = vmatprep.mubr.msk.f32.mxu1 %vm246_vm0, %v216_v22  ;;  %v204_v61 = vld [vmem:[%s1240_s20 + $0xf0] sm:$0xff]  ;;  %v205_v63 = vld [vmem:[%s1240_s20 + $0xf8] sm:$0xff]  ;;  %v1373_v1 = vld [vmem:[%s1515_s2] ss:$0 sm:$0xff] }
  0x25   : > { %v236_v62 = vld [vmem:[%s1240_s20 + $0x1f0] sm:$0xff]  ;;  %v237_v0 = vld [vmem:[%s1240_s20 + $0x1f8] sm:$0xff] }
  0x26   : > { %1103 = vmatmul.mubr.msk.f32.gmra.mrb[10].mxu0 %vm246_vm0, %v185_v23 }
  0x27   : > { %1151 = vmatmul.mubr.msk.f32.gmra.mrb[10].mxu1 %vm246_vm0, %v217_v24  ;;  %1105 = vmatprep.mubr.msk.f32.mxu0 %vm246_vm0, %v186_v25 }
  0x28   : > { %1153 = vmatprep.mubr.msk.f32.mxu1 %vm246_vm0, %v218_v26 }
  0x2a   : > { %1106 = vmatmul.mubr.msk.f32.gmra.mrb[12].mxu0 %vm246_vm0, %v187_v27 }
  0x2b   : > { %1154 = vmatmul.mubr.msk.f32.gmra.mrb[12].mxu1 %vm246_vm0, %v219_v28  ;;  %1108 = vmatprep.mubr.msk.f32.mxu0 %vm246_vm0, %v188_v29 }
  0x2c   : > { %1156 = vmatprep.mubr.msk.f32.mxu1 %vm246_vm0, %v220_v30 }
  0x2e   : > { %1109 = vmatmul.mubr.msk.f32.gmra.mrb[14].mxu0 %vm246_vm0, %v189_v31 }
  0x2f   : > { %1157 = vmatmul.mubr.msk.f32.gmra.mrb[14].mxu1 %vm246_vm0, %v221_v32  ;;  %1111 = vmatprep.mubr.msk.f32.mxu0 %vm246_vm0, %v190_v33 }
  0x30   : > { %1159 = vmatprep.mubr.msk.f32.mxu1 %vm246_vm0, %v222_v34 }
  0x32   : > { %1112 = vmatmul.mubr.msk.f32.gmra.mrb[16].mxu0 %vm246_vm0, %v191_v35 }
  0x33   : > { %1160 = vmatmul.mubr.msk.f32.gmra.mrb[16].mxu1 %vm246_vm0, %v223_v36  ;;  %1114 = vmatprep.mubr.msk.f32.mxu0 %vm246_vm0, %v192_v37 }
  0x34   : > { %1162 = vmatprep.mubr.msk.f32.mxu1 %vm246_vm0, %v224_v38 }
  0x36   : > { %1115 = vmatmul.mubr.msk.f32.gmra.mrb[18].mxu0 %vm246_vm0, %v193_v39 }
  0x37   : > { %1163 = vmatmul.mubr.msk.f32.gmra.mrb[18].mxu1 %vm246_vm0, %v225_v40  ;;  %1117 = vmatprep.mubr.msk.f32.mxu0 %vm246_vm0, %v194_v41 }
  0x38   : > { %1165 = vmatprep.mubr.msk.f32.mxu1 %vm246_vm0, %v226_v42 }
  0x3a   : > { %1118 = vmatmul.mubr.msk.f32.gmra.mrb[20].mxu0 %vm246_vm0, %v195_v43 }
  0x3b   : > { %1166 = vmatmul.mubr.msk.f32.gmra.mrb[20].mxu1 %vm246_vm0, %v227_v44  ;;  %1120 = vmatprep.mubr.msk.f32.mxu0 %vm246_vm0, %v196_v45 }
  0x3c   : > { %1168 = vmatprep.mubr.msk.f32.mxu1 %vm246_vm0, %v228_v46 }
  0x3e   : > { %1121 = vmatmul.mubr.msk.f32.gmra.mrb[22].mxu0 %vm246_vm0, %v197_v47 }
  0x3f   : > { %1169 = vmatmul.mubr.msk.f32.gmra.mrb[22].mxu1 %vm246_vm0, %v229_v48  ;;  %1123 = vmatprep.mubr.msk.f32.mxu0 %vm246_vm0, %v198_v49 }
  0x40   : > { %1171 = vmatprep.mubr.msk.f32.mxu1 %vm246_vm0, %v230_v50 }
  0x42   : > { %1124 = vmatmul.mubr.msk.f32.gmra.mrb[24].mxu0 %vm246_vm0, %v199_v51 }
  0x43   : > { %1172 = vmatmul.mubr.msk.f32.gmra.mrb[24].mxu1 %vm246_vm0, %v231_v52  ;;  %1126 = vmatprep.mubr.msk.f32.mxu0 %vm246_vm0, %v200_v53 }
  0x44   : > { %1174 = vmatprep.mubr.msk.f32.mxu1 %vm246_vm0, %v232_v54 }
  0x46   : > { %1127 = vmatmul.mubr.msk.f32.gmra.mrb[26].mxu0 %vm246_vm0, %v201_v55 }
  0x47   : > { %1175 = vmatmul.mubr.msk.f32.gmra.mrb[26].mxu1 %vm246_vm0, %v233_v56  ;;  %1129 = vmatprep.mubr.msk.f32.mxu0 %vm246_vm0, %v202_v57 }
  0x48   : > { %1177 = vmatprep.mubr.msk.f32.mxu1 %vm246_vm0, %v234_v58 }
  0x4a   : > { %1130 = vmatmul.mubr.msk.f32.gmra.mrb[28].mxu0 %vm246_vm0, %v203_v59 }
  0x4b   : > { %1178 = vmatmul.mubr.msk.f32.gmra.mrb[28].mxu1 %vm246_vm0, %v235_v60  ;;  %1132 = vmatprep.mubr.msk.f32.mxu0 %vm246_vm0, %v204_v61 }
  0x4c   : > { %1180 = vmatprep.mubr.msk.f32.mxu1 %vm246_vm0, %v236_v62 }
  0x4e   : > { %1133 = vmatmul.mubr.msk.f32.gmra.mrb[30].mxu0 %vm246_vm0, %v205_v63 }
  0x4f   : > { %1181 = vmatmul.mubr.msk.f32.gmra.mrb[30].mxu1 %vm246_vm0, %v237_v0 }
  0xe5   : > { %v1089_v2 = vpop.f32.mrb[0].mxu0 }
  0xe6   : > { %v1137_v3 = vpop.f32.mrb[0].mxu1  ;;  %v511_v4 = vadd.f32 %v1089_v2, %v1373_v1  ;;  %v505_v6 = vpop.f32.mrb[1].mxu0 }
  0xe7   : > { %v671_v5 = vadd.f32 %v1137_v3, %v1373_v1  ;;  %v665_v7 = vpop.f32.mrb[1].mxu1  ;;  %v506_v8 = vadd.f32 %v1373_v1, %v505_v6 }
  0xe8   : > { %v666_v9 = vadd.f32 %v1373_v1, %v665_v7  ;;  %825 = vst [vmem:[%s1380_s25 + $0x8] sm:$0xff] %v511_v4 }
  0xe9   : > { %857 = vst [vmem:[%s1380_s25 + $0x108] sm:$0xff] %v671_v5  ;;  %824 = vst [vmem:[%s1380_s25] sm:$0xff] %v506_v8  ;;  %v1092_v10 = vpop.f32.mrb[2].mxu0 }
  0xea   : > { %856 = vst [vmem:[%s1380_s25 + $0x100] sm:$0xff] %v666_v9  ;;  %v1140_v11 = vpop.f32.mrb[2].mxu1  ;;  %v521_v12 = vadd.f32 %v1092_v10, %v1373_v1  ;;  %v515_v14 = vpop.f32.mrb[3].mxu0 }
  0xeb   : > { %v681_v13 = vadd.f32 %v1140_v11, %v1373_v1  ;;  %v675_v15 = vpop.f32.mrb[3].mxu1  ;;  %v516_v16 = vadd.f32 %v1373_v1, %v515_v14 }
  0xec   : > { %v676_v17 = vadd.f32 %v1373_v1, %v675_v15  ;;  %827 = vst [vmem:[%s1380_s25 + $0x18] sm:$0xff] %v521_v12 }
  0xed   : > { %859 = vst [vmem:[%s1380_s25 + $0x118] sm:$0xff] %v681_v13  ;;  %826 = vst [vmem:[%s1380_s25 + $0x10] sm:$0xff] %v516_v16  ;;  %v1095_v18 = vpop.f32.mrb[4].mxu0 }
  0xee   : > { %858 = vst [vmem:[%s1380_s25 + $0x110] sm:$0xff] %v676_v17  ;;  %v1143_v19 = vpop.f32.mrb[4].mxu1  ;;  %v531_v20 = vadd.f32 %v1095_v18, %v1373_v1  ;;  %v525_v22 = vpop.f32.mrb[5].mxu0 }
  0xef   : > { %v691_v21 = vadd.f32 %v1143_v19, %v1373_v1  ;;  %v685_v23 = vpop.f32.mrb[5].mxu1  ;;  %v526_v24 = vadd.f32 %v1373_v1, %v525_v22 }
  0xf0   : > { %v686_v25 = vadd.f32 %v1373_v1, %v685_v23  ;;  %829 = vst [vmem:[%s1380_s25 + $0x28] sm:$0xff] %v531_v20 }
  0xf1   : > { %861 = vst [vmem:[%s1380_s25 + $0x128] sm:$0xff] %v691_v21  ;;  %828 = vst [vmem:[%s1380_s25 + $0x20] sm:$0xff] %v526_v24  ;;  %v1098_v26 = vpop.f32.mrb[6].mxu0 }
  0xf2   : > { %860 = vst [vmem:[%s1380_s25 + $0x120] sm:$0xff] %v686_v25  ;;  %v1146_v27 = vpop.f32.mrb[6].mxu1  ;;  %v541_v28 = vadd.f32 %v1098_v26, %v1373_v1  ;;  %v535_v30 = vpop.f32.mrb[7].mxu0 }
  0xf3   : > { %v701_v29 = vadd.f32 %v1146_v27, %v1373_v1  ;;  %v695_v31 = vpop.f32.mrb[7].mxu1  ;;  %v536_v32 = vadd.f32 %v1373_v1, %v535_v30 }
  0xf4   : > { %v696_v33 = vadd.f32 %v1373_v1, %v695_v31  ;;  %831 = vst [vmem:[%s1380_s25 + $0x38] sm:$0xff] %v541_v28 }
  0xf5   : > { %863 = vst [vmem:[%s1380_s25 + $0x138] sm:$0xff] %v701_v29  ;;  %830 = vst [vmem:[%s1380_s25 + $0x30] sm:$0xff] %v536_v32  ;;  %v1101_v34 = vpop.f32.mrb[8].mxu0 }
  0xf6   : > { %862 = vst [vmem:[%s1380_s25 + $0x130] sm:$0xff] %v696_v33  ;;  %v1149_v35 = vpop.f32.mrb[8].mxu1  ;;  %v551_v36 = vadd.f32 %v1101_v34, %v1373_v1  ;;  %v545_v38 = vpop.f32.mrb[9].mxu0 }
  0xf7   : > { %v711_v37 = vadd.f32 %v1149_v35, %v1373_v1  ;;  %v705_v39 = vpop.f32.mrb[9].mxu1  ;;  %v546_v40 = vadd.f32 %v1373_v1, %v545_v38 }
  0xf8   : > { %v706_v41 = vadd.f32 %v1373_v1, %v705_v39  ;;  %833 = vst [vmem:[%s1380_s25 + $0x48] sm:$0xff] %v551_v36 }
  0xf9   : > { %865 = vst [vmem:[%s1380_s25 + $0x148] sm:$0xff] %v711_v37  ;;  %832 = vst [vmem:[%s1380_s25 + $0x40] sm:$0xff] %v546_v40  ;;  %v1104_v42 = vpop.f32.mrb[10].mxu0 }
  0xfa   : > { %864 = vst [vmem:[%s1380_s25 + $0x140] sm:$0xff] %v706_v41  ;;  %v1152_v43 = vpop.f32.mrb[10].mxu1  ;;  %v561_v44 = vadd.f32 %v1104_v42, %v1373_v1  ;;  %v555_v46 = vpop.f32.mrb[11].mxu0 }
  0xfb   : > { %v721_v45 = vadd.f32 %v1152_v43, %v1373_v1  ;;  %v715_v47 = vpop.f32.mrb[11].mxu1  ;;  %v556_v48 = vadd.f32 %v1373_v1, %v555_v46 }
  0xfc   : > { %v716_v49 = vadd.f32 %v1373_v1, %v715_v47  ;;  %835 = vst [vmem:[%s1380_s25 + $0x58] sm:$0xff] %v561_v44 }
  0xfd   : > { %867 = vst [vmem:[%s1380_s25 + $0x158] sm:$0xff] %v721_v45  ;;  %834 = vst [vmem:[%s1380_s25 + $0x50] sm:$0xff] %v556_v48  ;;  %v1107_v50 = vpop.f32.mrb[12].mxu0 }
  0xfe   : > { %866 = vst [vmem:[%s1380_s25 + $0x150] sm:$0xff] %v716_v49  ;;  %v1155_v51 = vpop.f32.mrb[12].mxu1  ;;  %v571_v52 = vadd.f32 %v1107_v50, %v1373_v1  ;;  %v565_v54 = vpop.f32.mrb[13].mxu0 }
  0xff   : > { %v731_v53 = vadd.f32 %v1155_v51, %v1373_v1  ;;  %v725_v55 = vpop.f32.mrb[13].mxu1  ;;  %v566_v56 = vadd.f32 %v1373_v1, %v565_v54 }
 0x100   : > { %v726_v57 = vadd.f32 %v1373_v1, %v725_v55  ;;  %837 = vst [vmem:[%s1380_s25 + $0x68] sm:$0xff] %v571_v52 }
 0x101   : > { %869 = vst [vmem:[%s1380_s25 + $0x168] sm:$0xff] %v731_v53  ;;  %836 = vst [vmem:[%s1380_s25 + $0x60] sm:$0xff] %v566_v56  ;;  %v1110_v58 = vpop.f32.mrb[14].mxu0 }
 0x102   : > { %868 = vst [vmem:[%s1380_s25 + $0x160] sm:$0xff] %v726_v57  ;;  %v1158_v59 = vpop.f32.mrb[14].mxu1  ;;  %v581_v60 = vadd.f32 %v1110_v58, %v1373_v1  ;;  %v575_v62 = vpop.f32.mrb[15].mxu0 }
 0x103   : > { %v741_v61 = vadd.f32 %v1158_v59, %v1373_v1  ;;  %v735_v63 = vpop.f32.mrb[15].mxu1  ;;  %v576_v0 = vadd.f32 %v1373_v1, %v575_v62 }
 0x104   : > { %v736_v2 = vadd.f32 %v1373_v1, %v735_v63  ;;  %839 = vst [vmem:[%s1380_s25 + $0x78] sm:$0xff] %v581_v60 }
 0x105   : > { %871 = vst [vmem:[%s1380_s25 + $0x178] sm:$0xff] %v741_v61  ;;  %838 = vst [vmem:[%s1380_s25 + $0x70] sm:$0xff] %v576_v0  ;;  %v1113_v3 = vpop.f32.mrb[16].mxu0 }
 0x106   : > { %870 = vst [vmem:[%s1380_s25 + $0x170] sm:$0xff] %v736_v2  ;;  %v1161_v4 = vpop.f32.mrb[16].mxu1  ;;  %v591_v5 = vadd.f32 %v1113_v3, %v1373_v1  ;;  %v585_v7 = vpop.f32.mrb[17].mxu0 }
 0x107   : > { %v751_v6 = vadd.f32 %v1161_v4, %v1373_v1  ;;  %v745_v8 = vpop.f32.mrb[17].mxu1  ;;  %v586_v9 = vadd.f32 %v1373_v1, %v585_v7 }
 0x108   : > { %v746_v10 = vadd.f32 %v1373_v1, %v745_v8  ;;  %841 = vst [vmem:[%s1380_s25 + $0x88] sm:$0xff] %v591_v5 }
 0x109   : > { %873 = vst [vmem:[%s1380_s25 + $0x188] sm:$0xff] %v751_v6  ;;  %840 = vst [vmem:[%s1380_s25 + $0x80] sm:$0xff] %v586_v9  ;;  %v1116_v11 = vpop.f32.mrb[18].mxu0 }
 0x10a   : > { %872 = vst [vmem:[%s1380_s25 + $0x180] sm:$0xff] %v746_v10  ;;  %v1164_v12 = vpop.f32.mrb[18].mxu1  ;;  %v601_v13 = vadd.f32 %v1116_v11, %v1373_v1  ;;  %v595_v15 = vpop.f32.mrb[19].mxu0 }
 0x10b   : > { %v761_v14 = vadd.f32 %v1164_v12, %v1373_v1  ;;  %v755_v16 = vpop.f32.mrb[19].mxu1  ;;  %v596_v17 = vadd.f32 %v1373_v1, %v595_v15 }
 0x10c   : > { %v756_v18 = vadd.f32 %v1373_v1, %v755_v16  ;;  %843 = vst [vmem:[%s1380_s25 + $0x98] sm:$0xff] %v601_v13 }
 0x10d   : > { %875 = vst [vmem:[%s1380_s25 + $0x198] sm:$0xff] %v761_v14  ;;  %842 = vst [vmem:[%s1380_s25 + $0x90] sm:$0xff] %v596_v17  ;;  %v1119_v19 = vpop.f32.mrb[20].mxu0 }
 0x10e   : > { %874 = vst [vmem:[%s1380_s25 + $0x190] sm:$0xff] %v756_v18  ;;  %v1167_v20 = vpop.f32.mrb[20].mxu1  ;;  %v611_v21 = vadd.f32 %v1119_v19, %v1373_v1  ;;  %v605_v23 = vpop.f32.mrb[21].mxu0 }
 0x10f   : > { %v771_v22 = vadd.f32 %v1167_v20, %v1373_v1  ;;  %v765_v24 = vpop.f32.mrb[21].mxu1  ;;  %v606_v25 = vadd.f32 %v1373_v1, %v605_v23 }
 0x110   : > { %v766_v26 = vadd.f32 %v1373_v1, %v765_v24  ;;  %845 = vst [vmem:[%s1380_s25 + $0xa8] sm:$0xff] %v611_v21 }
 0x111   : > { %877 = vst [vmem:[%s1380_s25 + $0x1a8] sm:$0xff] %v771_v22  ;;  %844 = vst [vmem:[%s1380_s25 + $0xa0] sm:$0xff] %v606_v25  ;;  %v1122_v27 = vpop.f32.mrb[22].mxu0 }
 0x112   : > { %876 = vst [vmem:[%s1380_s25 + $0x1a0] sm:$0xff] %v766_v26  ;;  %v1170_v28 = vpop.f32.mrb[22].mxu1  ;;  %v621_v29 = vadd.f32 %v1122_v27, %v1373_v1  ;;  %v615_v31 = vpop.f32.mrb[23].mxu0 }
 0x113   : > { %v781_v30 = vadd.f32 %v1170_v28, %v1373_v1  ;;  %v775_v32 = vpop.f32.mrb[23].mxu1  ;;  %v616_v33 = vadd.f32 %v1373_v1, %v615_v31 }
 0x114   : > { %v776_v34 = vadd.f32 %v1373_v1, %v775_v32  ;;  %847 = vst [vmem:[%s1380_s25 + $0xb8] sm:$0xff] %v621_v29 }
 0x115   : > { %879 = vst [vmem:[%s1380_s25 + $0x1b8] sm:$0xff] %v781_v30  ;;  %846 = vst [vmem:[%s1380_s25 + $0xb0] sm:$0xff] %v616_v33  ;;  %v1125_v35 = vpop.f32.mrb[24].mxu0 }
 0x116   : > { %878 = vst [vmem:[%s1380_s25 + $0x1b0] sm:$0xff] %v776_v34  ;;  %v1173_v36 = vpop.f32.mrb[24].mxu1  ;;  %v631_v37 = vadd.f32 %v1125_v35, %v1373_v1  ;;  %v625_v39 = vpop.f32.mrb[25].mxu0 }
 0x117   : > { %v791_v38 = vadd.f32 %v1173_v36, %v1373_v1  ;;  %v785_v40 = vpop.f32.mrb[25].mxu1  ;;  %v626_v41 = vadd.f32 %v1373_v1, %v625_v39 }
 0x118   : > { %v786_v42 = vadd.f32 %v1373_v1, %v785_v40  ;;  %849 = vst [vmem:[%s1380_s25 + $0xc8] sm:$0xff] %v631_v37 }
 0x119   : > { %881 = vst [vmem:[%s1380_s25 + $0x1c8] sm:$0xff] %v791_v38  ;;  %848 = vst [vmem:[%s1380_s25 + $0xc0] sm:$0xff] %v626_v41  ;;  %v1128_v43 = vpop.f32.mrb[26].mxu0 }
 0x11a   : > { %880 = vst [vmem:[%s1380_s25 + $0x1c0] sm:$0xff] %v786_v42  ;;  %v1176_v44 = vpop.f32.mrb[26].mxu1  ;;  %v641_v45 = vadd.f32 %v1128_v43, %v1373_v1  ;;  %v635_v47 = vpop.f32.mrb[27].mxu0 }
 0x11b   : > { %v801_v46 = vadd.f32 %v1176_v44, %v1373_v1  ;;  %v795_v48 = vpop.f32.mrb[27].mxu1  ;;  %v636_v49 = vadd.f32 %v1373_v1, %v635_v47 }
 0x11c   : > { %v796_v50 = vadd.f32 %v1373_v1, %v795_v48  ;;  %851 = vst [vmem:[%s1380_s25 + $0xd8] sm:$0xff] %v641_v45 }
 0x11d   : > { %883 = vst [vmem:[%s1380_s25 + $0x1d8] sm:$0xff] %v801_v46  ;;  %850 = vst [vmem:[%s1380_s25 + $0xd0] sm:$0xff] %v636_v49  ;;  %v1131_v51 = vpop.f32.mrb[28].mxu0 }
 0x11e   : > { %882 = vst [vmem:[%s1380_s25 + $0x1d0] sm:$0xff] %v796_v50  ;;  %v1179_v52 = vpop.f32.mrb[28].mxu1  ;;  %v651_v53 = vadd.f32 %v1131_v51, %v1373_v1  ;;  %v645_v55 = vpop.f32.mrb[29].mxu0 }
 0x11f   : > { %v811_v54 = vadd.f32 %v1179_v52, %v1373_v1  ;;  %v805_v56 = vpop.f32.mrb[29].mxu1  ;;  %v646_v57 = vadd.f32 %v1373_v1, %v645_v55 }
 0x120   : > { %v806_v58 = vadd.f32 %v1373_v1, %v805_v56  ;;  %853 = vst [vmem:[%s1380_s25 + $0xe8] sm:$0xff] %v651_v53 }
 0x121   : > { %885 = vst [vmem:[%s1380_s25 + $0x1e8] sm:$0xff] %v811_v54  ;;  %852 = vst [vmem:[%s1380_s25 + $0xe0] sm:$0xff] %v646_v57  ;;  %v1134_v59 = vpop.f32.mrb[30].mxu0 }
 0x122   : > { %884 = vst [vmem:[%s1380_s25 + $0x1e0] sm:$0xff] %v806_v58  ;;  %v1182_v60 = vpop.f32.mrb[30].mxu1  ;;  %v661_v61 = vadd.f32 %v1134_v59, %v1373_v1  ;;  %v655_v63 = vpop.f32.mrb[31].mxu0 }
 0x123   : > { %v821_v62 = vadd.f32 %v1182_v60, %v1373_v1  ;;  %v815_v0 = vpop.f32.mrb[31].mxu1  ;;  %v656_v2 = vadd.f32 %v1373_v1, %v655_v63 }
 0x124   : > { %v816_v3 = vadd.f32 %v1373_v1, %v815_v0  ;;  %855 = vst [vmem:[%s1380_s25 + $0xf8] sm:$0xff] %v661_v61 }
 0x125   : > { %887 = vst [vmem:[%s1380_s25 + $0x1f8] sm:$0xff] %v821_v62  ;;  %854 = vst [vmem:[%s1380_s25 + $0xf0] sm:$0xff] %v656_v2 }
 0x126   : > { %886 = vst [vmem:[%s1380_s25 + $0x1f0] sm:$0xff] %v816_v3 }
 0x127 PF: > { %s13_s12 = sadd.s32 1, %s1199_s12  }
 0x128   : > { %p10_p4 = scmp.ge.s32.totalorder %s13_s12, 4  }
 0x12a   :  { %12 = sbr.rel (!%p10_p4) target bundleno = 1 (0x1), region = 62 }

</bundles_post_ra>
